<compile_context>
chip_gen: v5e
topology: v5e:2x2
jax: 0.10.0
libtpu: 0.0.40
codegen_flags: <defaults>
</compile_context>

<pallas_src>
import jax
import jax.numpy as jnp
from jax import lax
from jax.experimental import pallas as pl
from jax.experimental.pallas import tpu as pltpu


def _linear_dict_kernel(x_ref, bias_ref, e_ref, d_ref, xhat_ref, f_ref, acc_ref):
    k = pl.program_id(1)
    num_k = pl.num_programs(1)

    # ---- Encode (partial over this K tile): f = (x - bias) @ E_tile^T ----
    # Contract last dims of (tb, A) and (Kt, A) -> (tb, Kt); no transpose.
    x_centered = x_ref[...] - bias_ref[...]
    f = lax.dot_general(
        x_centered, e_ref[...],
        dimension_numbers=(((1,), (1,)), ((), ())),
        preferred_element_type=jnp.float32)
    f_ref[...] = f.astype(f_ref.dtype)

    # ---- Decode (accumulate over K tiles): x_hat += f @ D_tile^T ----
    @pl.when(k == 0)
    def _():
        acc_ref[...] = jnp.zeros_like(acc_ref)

    # Contract last dims of (tb, Kt) and (A, Kt) -> (tb, A); no transpose.
    acc_ref[...] += lax.dot_general(
        f, d_ref[...],
        dimension_numbers=(((1,), (1,)), ((), ())),
        preferred_element_type=jnp.float32)

    @pl.when(k == num_k - 1)
    def _():
        xhat_ref[...] = (acc_ref[...] + bias_ref[...]).astype(xhat_ref.dtype)


def _choose_tiles(B, A, K, itemsize, vmem_budget_bytes=40 * 1024 * 1024):
    """Pick (tile_b, k_tile) that respect the (8,128) rule and a VMEM budget."""
    # Batch tile: big enough to fill the MXU M dimension, multiple of 8.
    if B >= 256:
        tile_b = 256
    else:
        tile_b = max(8, ((B + 7) // 8) * 8)

    def footprint(tb, kt):
        # double-buffered pipeline blocks + f32 accumulator scratch
        per_step = (tb * A        # x
                    + A           # bias
                    + kt * A      # E tile
                    + A * kt      # D tile
                    + tb * A      # x_hat
                    + tb * kt)    # f
        return 2 * per_step * itemsize + tb * A * 4

    # Dict tile: keep full K (weights stay VMEM-resident, never re-DMA'd
    # across the batch axis since their block index is constant) unless it
    # blows the budget AND K can be split into lane-dense 128-multiples.
    k_tile = K
    if footprint(tile_b, k_tile) > vmem_budget_bytes and K % 128 == 0:
        k_tile = 128
        for cand in (4096, 2048, 1024, 512, 256, 128):
            if K % cand == 0 and footprint(tile_b, cand) <= vmem_budget_bytes:
                k_tile = cand
                break

    # Last resort: shrink the batch tile.
    while footprint(tile_b, k_tile) > vmem_budget_bytes and tile_b > 8:
        tile_b = max(8, tile_b // 2)

    return tile_b, k_tile


def linear_dictionary_forward(x, bias, E, D, *, output_features=True):
    """x: (B, A); bias: (A,); E: (K, A); D: (A, K). Returns x_hat (and f)."""
    B, A = x.shape
    K, _ = E.shape
    itemsize = jnp.dtype(x.dtype).itemsize

    tile_b, k_tile = _choose_tiles(B, A, K, itemsize)

    # Pad ragged batches (extra rows compute garbage and are sliced off).
    B_pad = ((B + tile_b - 1) // tile_b) * tile_b
    x_in = jnp.pad(x, ((0, B_pad - B), (0, 0))) if B_pad != B else x
    bias2d = bias.reshape(1, A)

    grid = (B_pad // tile_b, K // k_tile)

    out_shapes = (
        jax.ShapeDtypeStruct((B_pad, A), x.dtype),   # x_hat
        jax.ShapeDtypeStruct((B_pad, K), x.dtype),   # f
    )

    cost = pl.CostEstimate(
        flops=4 * B_pad * A * K,            # two (B x A x K) matmuls
        transcendentals=0,
        bytes_accessed=(2 * B_pad * A + A + 2 * K * A + B_pad * K) * itemsize,
    )

    x_hat, f = pl.pallas_call(
        _linear_dict_kernel,
        out_shape=out_shapes,
        grid_spec=pltpu.PrefetchScalarGridSpec(
            num_scalar_prefetch=0,
            grid=grid,
            in_specs=[
                pl.BlockSpec((tile_b, A), lambda i, k: (i, 0)),   # x tile
                pl.BlockSpec((1, A),      lambda i, k: (0, 0)),   # bias
                pl.BlockSpec((k_tile, A), lambda i, k: (k, 0)),   # E tile
                pl.BlockSpec((A, k_tile), lambda i, k: (0, k)),   # D tile
            ],
            out_specs=[
                pl.BlockSpec((tile_b, A),      lambda i, k: (i, 0)),  # x_hat
                pl.BlockSpec((tile_b, k_tile), lambda i, k: (i, k)),  # f
            ],
            scratch_shapes=[pltpu.VMEM((tile_b, A), jnp.float32)],
        ),
        compiler_params=pltpu.CompilerParams(
            dimension_semantics=("parallel", "arbitrary"),
            vmem_limit_bytes=48 * 1024 * 1024,
        ),
        cost_estimate=cost,
    )(x_in, bias2d, E, D)

    if B_pad != B:
        x_hat = x_hat[:B]
        f = f[:B]

    if output_features:
        return x_hat, f
    return x_hat


if __name__ == "__main__":
    # Small shapes consistent with the module: batch=16, activation_dim=32, dict_size=64
    batch, activation_dim, dict_size = 16, 32, 64

    key = jax.random.PRNGKey(0)
    kx, ke = jax.random.split(key)

    x = jax.random.normal(kx, (batch, activation_dim), dtype=jnp.float32)

    # Deterministic parameter init mirroring __init__:
    #   bias = zeros(activation_dim); E = randn(dict_size, activation_dim); D = E.T
    bias = jnp.zeros((activation_dim,), dtype=jnp.float32)
    E = jax.random.normal(ke, (dict_size, activation_dim), dtype=jnp.float32)
    D = E.T

    x_hat, f = linear_dictionary_forward(x, bias, E, D, output_features=True)
    jax.block_until_ready((x_hat, f))

    # Reference check against plain-JAX semantics of the PyTorch forward.
    f_ref = (x - bias) @ E.T
    x_hat_ref = f_ref @ D.T + bias
    assert jnp.allclose(f, f_ref, atol=1e-4, rtol=1e-4)
    assert jnp.allclose(x_hat, x_hat_ref, atol=1e-3, rtol=1e-3)

    print("KERNEL_OK")
</pallas_src>

<mosaic_0001>
module attributes {stable_mosaic.version = 11 : i64} {
  func.func @_linear_dict_kernel(%arg0: i32, %arg1: i32, %arg2: memref<16x32xf32, #tpu.memory_space<vmem>>, %arg3: memref<1x32xf32, #tpu.memory_space<vmem>>, %arg4: memref<64x32xf32, #tpu.memory_space<vmem>>, %arg5: memref<32x64xf32, #tpu.memory_space<vmem>>, %arg6: memref<16x32xf32, #tpu.memory_space<vmem>>, %arg7: memref<16x64xf32, #tpu.memory_space<vmem>>, %arg8: memref<16x32xf32, #tpu.memory_space<vmem>>) attributes {dimension_semantics = [#tpu.dimension_semantics<parallel>, #tpu.dimension_semantics<arbitrary>], iteration_bounds = array<i64: 1, 1>, scalar_prefetch = 0 : i64, scratch_operands = 1 : i64, tpu.core_type = #tpu.core_type<tc>, window_params = [{transform_indices = @transform_0, window_bounds = array<i64: 16, 32>}, {pipeline_mode = #tpu.pipeline_mode<synchronous>, transform_indices = @transform_1, window_bounds = array<i64: 1, 32>}, {transform_indices = @transform_2, window_bounds = array<i64: 64, 32>}, {transform_indices = @transform_3, window_bounds = array<i64: 32, 64>}, {transform_indices = @transform_4, window_bounds = array<i64: 16, 32>}, {transform_indices = @transform_5, window_bounds = array<i64: 16, 64>}]} {
    %c0 = arith.constant 0 : index
    %c0_0 = arith.constant 0 : index
    %0 = vector.load %arg2[%c0, %c0_0] : memref<16x32xf32, #tpu.memory_space<vmem>>, vector<16x32xf32>
    %c0_1 = arith.constant 0 : index
    %c0_2 = arith.constant 0 : index
    %1 = vector.load %arg3[%c0_1, %c0_2] : memref<1x32xf32, #tpu.memory_space<vmem>>, vector<1x32xf32>
    %2 = vector.broadcast %1 : vector<1x32xf32> to vector<16x32xf32>
    %3 = arith.subf %0, %2 : vector<16x32xf32>
    %c0_3 = arith.constant 0 : index
    %c0_4 = arith.constant 0 : index
    %4 = vector.load %arg4[%c0_3, %c0_4] : memref<64x32xf32, #tpu.memory_space<vmem>>, vector<64x32xf32>
    %cst = arith.constant dense<0.000000e+00> : vector<16x64xf32>
    %5 = tpu.matmul %3, %4, %cst {dimension_numbers = #tpu.dot_dimension_numbers<[1], [1], [0], [0], [0, 0, 1, 0], [], []>} : vector<16x32xf32>, vector<64x32xf32>, vector<16x64xf32> -> vector<16x64xf32>
    %c0_5 = arith.constant 0 : index
    %c0_6 = arith.constant 0 : index
    %6 = vector.load %arg7[%c0_5, %c0_6] : memref<16x64xf32, #tpu.memory_space<vmem>>, vector<16x64xf32>
    tpu.vector_store %arg7[%c0_5, %c0_6], %5 {strides = array<i32>} : memref<16x64xf32, #tpu.memory_space<vmem>>, vector<16x64xf32>,
    %c0_i32 = arith.constant 0 : i32
    %7 = arith.cmpi eq, %arg1, %c0_i32 : i32
    %8 = arith.extui %7 : i1 to i32
    %c0_i32_7 = arith.constant 0 : i32
    %9 = arith.cmpi ne, %8, %c0_i32_7 : i32
    scf.if %9 {
      %cst_17 = arith.constant 0.000000e+00 : f32
      %18 = vector.broadcast %cst_17 : f32 to vector<16x32xf32>
      %c0_18 = arith.constant 0 : index
      %c0_19 = arith.constant 0 : index
      %19 = vector.load %arg8[%c0_18, %c0_19] : memref<16x32xf32, #tpu.memory_space<vmem>>, vector<16x32xf32>
      tpu.vector_store %arg8[%c0_18, %c0_19], %18 {strides = array<i32>} : memref<16x32xf32, #tpu.memory_space<vmem>>, vector<16x32xf32>,
    } else {
    }
    %c0_8 = arith.constant 0 : index
    %c0_9 = arith.constant 0 : index
    %10 = vector.load %arg8[%c0_8, %c0_9] : memref<16x32xf32, #tpu.memory_space<vmem>>, vector<16x32xf32>
    %c0_10 = arith.constant 0 : index
    %c0_11 = arith.constant 0 : index
    %11 = vector.load %arg5[%c0_10, %c0_11] : memref<32x64xf32, #tpu.memory_space<vmem>>, vector<32x64xf32>
    %cst_12 = arith.constant dense<0.000000e+00> : vector<16x32xf32>
    %12 = tpu.matmul %5, %11, %cst_12 {dimension_numbers = #tpu.dot_dimension_numbers<[1], [1], [0], [0], [0, 0, 1, 0], [], []>} : vector<16x64xf32>, vector<32x64xf32>, vector<16x32xf32> -> vector<16x32xf32>
    %13 = arith.addf %10, %12 : vector<16x32xf32>
    %c0_13 = arith.constant 0 : index
    %c0_14 = arith.constant 0 : index
    %14 = vector.load %arg8[%c0_13, %c0_14] : memref<16x32xf32, #tpu.memory_space<vmem>>, vector<16x32xf32>
    tpu.vector_store %arg8[%c0_13, %c0_14], %13 {strides = array<i32>} : memref<16x32xf32, #tpu.memory_space<vmem>>, vector<16x32xf32>,
    %c0_i32_15 = arith.constant 0 : i32
    %15 = arith.cmpi eq, %arg1, %c0_i32_15 : i32
    %16 = arith.extui %15 : i1 to i32
    %c0_i32_16 = arith.constant 0 : i32
    %17 = arith.cmpi ne, %16, %c0_i32_16 : i32
    scf.if %17 {
      %c0_17 = arith.constant 0 : index
      %c0_18 = arith.constant 0 : index
      %18 = vector.load %arg8[%c0_17, %c0_18] : memref<16x32xf32, #tpu.memory_space<vmem>>, vector<16x32xf32>
      %c0_19 = arith.constant 0 : index
      %c0_20 = arith.constant 0 : index
      %19 = vector.load %arg3[%c0_19, %c0_20] : memref<1x32xf32, #tpu.memory_space<vmem>>, vector<1x32xf32>
      %20 = vector.broadcast %19 : vector<1x32xf32> to vector<16x32xf32>
      %21 = arith.addf %18, %20 : vector<16x32xf32>
      %c0_21 = arith.constant 0 : index
      %c0_22 = arith.constant 0 : index
      %22 = vector.load %arg6[%c0_21, %c0_22] : memref<16x32xf32, #tpu.memory_space<vmem>>, vector<16x32xf32>
      tpu.vector_store %arg6[%c0_21, %c0_22], %21 {strides = array<i32>} : memref<16x32xf32, #tpu.memory_space<vmem>>, vector<16x32xf32>,
    } else {
    }
    return
  }
  func.func @transform_0(%arg0: i32, %arg1: i32) -> (i32, i32) {
    %c0_i32 = arith.constant 0 : i32
    %c0_i32_0 = arith.constant 0 : i32
    return %arg0, %c0_i32 : i32, i32
  }
  func.func @transform_1(%arg0: i32, %arg1: i32) -> (i32, i32) {
    %c0_i32 = arith.constant 0 : i32
    %c0_i32_0 = arith.constant 0 : i32
    %c0_i32_1 = arith.constant 0 : i32
    return %c0_i32, %c0_i32_0 : i32, i32
  }
  func.func @transform_2(%arg0: i32, %arg1: i32) -> (i32, i32) {
    %c0_i32 = arith.constant 0 : i32
    %c0_i32_0 = arith.constant 0 : i32
    return %arg1, %c0_i32 : i32, i32
  }
  func.func @transform_3(%arg0: i32, %arg1: i32) -> (i32, i32) {
    %c0_i32 = arith.constant 0 : i32
    %c0_i32_0 = arith.constant 0 : i32
    return %c0_i32, %arg1 : i32, i32
  }
  func.func @transform_4(%arg0: i32, %arg1: i32) -> (i32, i32) {
    %c0_i32 = arith.constant 0 : i32
    %c0_i32_0 = arith.constant 0 : i32
    return %arg0, %c0_i32 : i32, i32
  }
  func.func @transform_5(%arg0: i32, %arg1: i32) -> (i32, i32) {
    %c0_i32 = arith.constant 0 : i32
    return %arg0, %arg1 : i32, i32
  }
}

</mosaic_0001>

<bundles_post_ra>
// kernel: tpu_custom_call.1
= control target key start
LH: loop header
LB: loop body
LE: loop exit
PB: predicated region body
PF: predicated region fallthrough
CT: control target
= control target key end

     0   :  { %11 = vsyncpa [#allocation4], 0  ;;  %vm37_vm0 = vcmask 261120   ;;  %vm91_vm1 = vcmask 523264   ;;  %s404_s0 = inlined_call_operand.vmem [shape: f32[16,32], index: 0, kind: input, shape index: {}]   ;;  %s405_s1 = inlined_call_operand.vmem [shape: f32[1,32], index: 1, kind: input, shape index: {}]   ;;  %s406_s2 = inlined_call_operand.vmem [shape: f32[64,32], index: 2, kind: input, shape index: {}]   ;;  %s407_s3 = inlined_call_operand.vmem [shape: f32[32,64], index: 3, kind: input, shape index: {}]   ;;  %s408_s4 = inlined_call_operand.hbm [shape: f32[16,32], index: 4, kind: output, shape index: {0}]   ;;  %s409_s5 = inlined_call_operand.hbm [shape: f32[16,64], index: 5, kind: output, shape index: {1}]  }
   0x1   :  { %v36_v0 = vld [vmem:[%s406_s2 + $0x38] sm:$0xff]  ;;  %v35_v1 = vld [vmem:[%s406_s2 + $0x30] sm:$0xff] }
   0x2   :  { %200 = vmatpush.xpose.msk.msra.mxu0 %vm37_vm0, %v36_v0  ;;  %216 = vmatpush.xpose.msk.msra.mxu2 %vm37_vm0, %v36_v0  ;;  %v105_v2 = vld [vmem:[%s407_s3 + $0x18] sm:$0xff] }
   0x6   :  { %201 = vmatpush.xpose.msk.msra.mxu0 %vm37_vm0, %v35_v1  ;;  %217 = vmatpush.xpose.msk.msra.mxu2 %vm37_vm0, %v35_v1 }
   0x7   :  { %12 = vsyncpa [#allocation6], 0  ;;  %v34_v3 = vld [vmem:[%s406_s2 + $0x28] sm:$0xff]  ;;  %210 = vmatpush.xpose.msk.msra.mxu1 %vm91_vm1, %v105_v2  ;;  %v104_v4 = vld [vmem:[%s407_s3 + $0x10] sm:$0xff]  ;;  %v283_v17 = vmov 0.0   ;;  %s183_s24 = sshll.u32 %s409_s5, 4  ;;  %s184_s24 = int_to_ptr.hbm [resolvable:$true] %s183_s24 }
   0x8   :  { %v33_v5 = vld [vmem:[%s406_s2 + $0x20] sm:$0xff]  ;;  %v103_v6 = vld [vmem:[%s407_s3 + $0x8] sm:$0xff]  ;;  %v32_v7 = vld [vmem:[%s406_s2 + $0x18] sm:$0xff]  ;;  %98 = vst.msk [vmem:[#allocation2] sm:$0xff] %vm37_vm0, %v283_v17  ;;  %s285_s25 = smov 128   ;;  %s286_s26 = smov 8  }
   0x9   :  { %v102_v8 = vld [vmem:[%s407_s3] sm:$0xff]  ;;  %v31_v9 = vld [vmem:[%s406_s2 + $0x10] sm:$0xff]  ;;  %v30_v10 = vld [vmem:[%s406_s2 + $0x8] sm:$0xff]  ;;  %99 = vst.msk [vmem:[#allocation2 + $0x8] sm:$0xff] %vm37_vm0, %v283_v17  ;;  %s287_s5 = smov [#allocation3]   ;;  %s170_s7 = sshll.u32 %s408_s4, 4  ;;  %s171_s7 = int_to_ptr.hbm [resolvable:$true] %s170_s7 }
   0xa   :  { %202 = vmatpush.xpose.msk.msra.mxu0 %vm37_vm0, %v34_v3  ;;  %218 = vmatpush.xpose.msk.msra.mxu2 %vm37_vm0, %v34_v3  ;;  %v229_v11 = vld [vmem:[%s405_s1] ss:$0 sm:$0xff]  ;;  %v22_v13 = vld [vmem:[%s404_s0 + $0x8] sm:$0xff]  ;;  %s168_s29 = sshll.u32 %s287_s5, 4  ;;  %s169_s29 = int_to_ptr.vmem [resolvable:$true] %s168_s29 }
   0xb   :  { %211 = vmatpush.xpose.msk.msra.mxu1 %vm91_vm1, %v104_v4  ;;  %v21_v12 = vld [vmem:[%s404_s0] sm:$0xff]  ;;  %v28_v16 = vsub.f32 %v22_v13, %v229_v11  ;;  %s284_s0 = smov [#allocation5]  }
   0xc   :  { %v29_v14 = vld [vmem:[%s406_s2] sm:$0xff]  ;;  %v27_v15 = vsub.f32 %v21_v12, %v229_v11  ;;  %s181_s2 = sshll.u32 %s284_s0, 4  ;;  %s182_s2 = int_to_ptr.vmem [resolvable:$true] %s181_s2 }
   0xd   :  { %v230_v24 = vld [vmem:[%s405_s1] ss:$0 sm:$0xff] }
   0xe   :  { %203 = vmatpush.xpose.msk.msra.mxu0 %vm37_vm0, %v33_v5  ;;  %219 = vmatpush.xpose.msk.msra.mxu2 %vm37_vm0, %v33_v5 }
   0xf   :  { %212 = vmatpush.xpose.msk.msra.mxu1 %vm91_vm1, %v103_v6  ;;  %v100_v20 = vld [vmem:[#allocation2] sm:$0xff] }
  0x10   :  { %v101_v23 = vld [vmem:[#allocation2 + $0x8] sm:$0xff] }
  0x12   :  { %204 = vmatpush.xpose.msk.msra.mxu0 %vm37_vm0, %v32_v7  ;;  %220 = vmatpush.xpose.msk.msra.mxu2 %vm37_vm0, %v32_v7 }
  0x13   :  { %213 = vmatpush.xpose.msk.msra.mxu1 %vm91_vm1, %v102_v8 }
  0x16   :  { %205 = vmatpush.xpose.msk.msra.mxu0 %vm37_vm0, %v31_v9  ;;  %221 = vmatpush.xpose.msk.msra.mxu2 %vm37_vm0, %v31_v9 }
  0x1a   :  { %206 = vmatpush.xpose.msk.msra.mxu0 %vm37_vm0, %v30_v10  ;;  %222 = vmatpush.xpose.msk.msra.mxu2 %vm37_vm0, %v30_v10 }
  0x1e   :  { %207 = vmatpush.xpose.msk.msra.mxu0 %vm37_vm0, %v29_v14  ;;  %223 = vmatpush.xpose.msk.msra.mxu2 %vm37_vm0, %v29_v14 }
  0x21   :  { %208 = vmatmul.msk.f32.vlgmr.msra.gmra.mxu0 %vm37_vm0, %v27_v15  ;;  %209 = vmatmul.msk.f32.vlgmr.msra.gmra.mxu2 %vm37_vm0, %v28_v16 }
  0x9e   :  { %v85_v18 = vpop.f32.mrf.mxu0 }
  0x9f   :  { %92 = vst.msk [vmem:[#allocation5] sm:$0xff] %vm91_vm1, %v85_v18  ;;  %214 = vmatmul.msk.f32.vlgmr.msra.gmra.mxu1 %vm91_vm1, %v85_v18 }
  0xa4   :  { %v88_v19 = vpop.f32.mrf.mxu2 }
  0xa5   :  { %93 = vst.msk [vmem:[#allocation5 + $0x8] sm:$0xff] %vm91_vm1, %v88_v19 }
  0xa6   :  { %189 = dma.vmem_to_hbm [thread:$0]  %s182_s2, 256, %s184_s24, [#allocation6], %s285_s25, %s285_s25, %s286_s26  }
  0xa7   :  { %215 = vmatmul.msk.f32.gmra.mxu1 %vm91_vm1, %v88_v19 }
 0x11c   :  { %v141_v21 = vpop.f32.mrf.mxu1 }
 0x11d   :  { %v147_v22 = vadd.f32 %v141_v21, %v100_v20 }
 0x11f   :  { %149 = vst.msk [vmem:[#allocation2] sm:$0xff] %vm37_vm0, %v147_v22 }
 0x124   :  { %v144_v25 = vpop.f32.mrf.mxu1 }
 0x125   :  { %v148_v26 = vadd.f32 %v144_v25, %v101_v23 }
 0x126   :  { %v154_v27 = vld [vmem:[#allocation2] sm:$0xff] }
 0x127   :  { %150 = vst.msk [vmem:[#allocation2 + $0x8] sm:$0xff] %vm37_vm0, %v148_v26  ;;  %v160_v28 = vadd.f32 %v230_v24, %v154_v27 }
 0x129   :  { %162 = vst.msk [vmem:[#allocation3] sm:$0xff] %vm37_vm0, %v160_v28 }
 0x12e   :  { %v155_v29 = vld [vmem:[#allocation2 + $0x8] sm:$0xff] }
 0x12f   :  { %v161_v30 = vadd.f32 %v230_v24, %v155_v29 }
 0x131   :  { %163 = vst.msk [vmem:[#allocation3 + $0x8] sm:$0xff] %vm37_vm0, %v161_v30 }
 0x132   :  { %176 = dma.vmem_to_hbm [thread:$0]  %s169_s29, 256, %s171_s7, [#allocation4], %s285_s25, %s285_s25, %s286_s26  }
 0x133   :  { %279 = dma.done.wait [#allocation4], 256  }
 0x134   :  { %280 = vsyncadd [#allocation4], 4294967040 }
 0x135   :  { %281 = dma.done.wait [#allocation6], 256  }
 0x136   :  { %282 = vsyncadd [#allocation6], 4294967040 }
 0x137   :  { %198 = vsyncpa [#allocation4], 1 }
 0x138   :  { %199 = vsyncpa [#allocation6], 1 }

</bundles_post_ra>
